<compile_context>
chip_gen: v6e
topology: v6e:2x2x1
jax: 0.10.0
libtpu: 0.0.40
codegen_flags: <defaults>
</compile_context>

<pallas_src>
import jax
import jax.numpy as jnp
from jax.experimental import pallas as pl
from jax.experimental.pallas import tpu as pltpu

_MIB = 1024 * 1024


def _round_up(x: int, m: int) -> int:
    return (x + m - 1) // m * m


def _chip_config():
    """Returns (vmem tiling budget, vmem_limit cap, is_v7x) for the local chip."""
    try:
        kind = jax.devices()[0].device_kind.lower()
    except Exception:
        kind = ""
    if "v7" in kind:
        # 64 MiB physical VMEM per TensorCore: stay well clear of it.
        return 40 * _MIB, 56 * _MIB, True
    if "v5" in kind or "v6" in kind:
        # 128 MiB physical VMEM: use most of it (default scoped limit is tiny).
        return 76 * _MIB, 100 * _MIB, False
    # Unknown chip: be v7x-safe.
    return 40 * _MIB, 56 * _MIB, False


def _make_mlp_kernel(num_layers: int, relu_last: bool):
    """Fused bf16-matmul + f32-bias(+ReLU) chain over one [TM, Din] tile."""

    def kernel(x_ref, *refs):
        # refs = (w0, b0, w1, b1, ..., w_{L-1}, b_{L-1}, o_ref)
        o_ref = refs[-1]
        y = x_ref[...].astype(jnp.bfloat16)        # MXU in bf16, f32 accumulate
        for i in range(num_layers):
            w = refs[2 * i][...]                   # bf16 [K_pad, N_pad]
            b = refs[2 * i + 1][...]               # f32  [1,    N_pad]
            y = jnp.dot(y, w, preferred_element_type=jnp.float32) + b
            if i < num_layers - 1:
                y = jnp.maximum(y, 0.0).astype(jnp.bfloat16)
            elif relu_last:
                y = jnp.maximum(y, 0.0)
        o_ref[...] = y.astype(o_ref.dtype)

    return kernel


def _fused_chunk(x2d, layers, *, relu_last, max_tm, budget, limit_cap, is_v7):
    """One pallas_call fusing a consecutive stack of Linear(+ReLU) layers."""
    m, din = x2d.shape
    nl = len(layers)
    dims = [din] + [w.shape[1] for (w, _) in layers]
    dout = dims[-1]
    # Hidden dims lane-padded to 128; input/output dims left unpadded (block
    # dim == full array dim is legal), so streamed x / out tiles carry no
    # padding bytes.  Zero-padded cols are exact: zero W + zero b -> ReLU(0)=0.
    dims_pad = [din] + [_round_up(d, 128) for d in dims[1:-1]] + [dout]

    padded, w_bytes = [], 0
    for i, (w, b) in enumerate(layers):
        kp, npad = dims_pad[i], dims_pad[i + 1]
        w_p = jnp.pad(w, ((0, kp - w.shape[0]), (0, npad - w.shape[1])))
        w_p = w_p.astype(jnp.bfloat16)
        # Biases kept f32: added straight onto the f32 accumulator, VMEM cost
        # is negligible and accuracy is strictly better.
        b_p = jnp.pad(b, (0, npad - b.shape[0])).reshape(1, npad)
        b_p = b_p.astype(jnp.float32)
        padded.append((w_p, b_p))
        w_bytes += kp * npad * 2 + npad * 4

    # TM from the VMEM budget: weights counted once (single-buffered), x/out
    # tiles double-buffered (f32), plus f32+bf16 live activations per row.
    max_pad = max(dims_pad)
    row_bytes = 4 * 2 * din + 4 * 2 * dout + 8 * max_pad + 128
    avail = max(budget - w_bytes, 256 * row_bytes)
    tm_cap = max(256, min(max_tm, avail // row_bytes))
    if m <= tm_cap:
        tm = _round_up(max(m, 16), 16)          # bf16 sublane packing: mult of 16
    else:
        tm = max(256, (tm_cap // 128) * 128)
    m_pad = _round_up(m, tm)
    x_p = x2d if m_pad == m else jnp.pad(x2d, ((0, m_pad - m), (0, 0)))

    grid = (m_pad // tm,)
    # Limit covers the worst case (double-buffered weights on the fallback
    # path) plus compiler-internal scratch headroom, capped per chip.
    vmem_limit = int(min(limit_cap, 2 * w_bytes + tm * row_bytes + 6 * _MIB))

    flops = 2 * m_pad * sum(dims_pad[i] * dims_pad[i + 1] for i in range(nl))
    cost = pl.CostEstimate(
        flops=flops,
        transcendentals=0,
        bytes_accessed=m_pad * (din + dout) * 4 + w_bytes,
    )

    kernel = _make_mlp_kernel(nl, relu_last)
    out_shape = jax.ShapeDtypeStruct((m_pad, dout), x2d.dtype)

    def run(single_buffer_weights, semantics):
        in_specs = [pl.BlockSpec((tm, din), lambda i: (i, 0))]
        inputs = [x_p]
        kw = {"pipeline_mode": pl.Buffered(1)} if single_buffer_weights else {}
        for (w_p, b_p) in padded:
            # Resident across grid steps: same block index every iteration.
            in_specs.append(pl.BlockSpec(w_p.shape, lambda i: (0, 0), **kw))
            in_specs.append(pl.BlockSpec(b_p.shape, lambda i: (0, 0), **kw))
            inputs.extend([w_p, b_p])
        return pl.pallas_call(
            kernel,
            out_shape=out_shape,
            grid=grid,
            in_specs=in_specs,
            out_specs=pl.BlockSpec((tm, dout), lambda i: (i, 0)),
            compiler_params=pltpu.CompilerParams(
                dimension_semantics=semantics,
                vmem_limit_bytes=vmem_limit,
            ),
            cost_estimate=cost,
        )(*inputs)

    # Preferred config first; degrade gracefully if a feature (Buffered(1),
    # CORE_PARALLEL) is unavailable on this chip / JAX build.
    attempts = [(True, ("parallel",)), (False, ("parallel",))]
    if is_v7 and grid[0] >= 2:
        attempts.insert(0, (True, (pltpu.CORE_PARALLEL,)))
    for sb, sem in attempts[:-1]:
        try:
            return run(sb, sem)[:m]
        except Exception:
            continue
    return run(*attempts[-1])[:m]


def mlp_forward(x, params, *, max_tm=2048):
    """x: [..., input_dim] -> [..., output_dim]; ReLU on all layers but the last."""
    lead = x.shape[:-1]
    x2d = x.reshape(-1, x.shape[-1])
    budget, limit_cap, is_v7 = _chip_config()

    # Group consecutive layers so the resident bf16 weight stack stays a small
    # fraction of the VMEM budget; normally this is a single chunk -> ONE fused
    # pallas_call with no intermediate-activation HBM round-trips.
    w_limit = max(budget // 5, 2 * _MIB)
    chunks, cur, cur_b = [], [], 0
    for (w, b) in params:
        lb = (_round_up(w.shape[0], 128) * _round_up(w.shape[1], 128) * 2
              + _round_up(w.shape[1], 128) * 4)
        if cur and cur_b + lb > w_limit:
            chunks.append(cur)
            cur, cur_b = [], 0
        cur.append((w, b))
        cur_b += lb
    chunks.append(cur)

    y = x2d
    for ci, chunk in enumerate(chunks):
        y = _fused_chunk(
            y, chunk,
            relu_last=(ci < len(chunks) - 1),   # interior chunk ends mid-stack
            max_tm=max_tm, budget=budget, limit_cap=limit_cap, is_v7=is_v7)
    return y.reshape(*lead, params[-1][0].shape[1])


def init_mlp_params(key, input_dim, hidden_dim, output_dim, num_layers):
    """Mimics nn.Linear default init: U(-1/sqrt(fan_in), 1/sqrt(fan_in))."""
    h = [hidden_dim] * (num_layers - 1)
    dims_in = [input_dim] + h
    dims_out = h + [output_dim]
    params = []
    for n, k_out in zip(dims_in, dims_out):
        key, kw, kb = jax.random.split(key, 3)
        bound = 1.0 / (n ** 0.5)
        # torch weight is (out, in); store transposed (in, out) for x @ W^T
        w = jax.random.uniform(kw, (n, k_out), jnp.float32, -bound, bound)
        b = jax.random.uniform(kb, (k_out,), jnp.float32, -bound, bound)
        params.append((w, b))
    return params


def mlp_reference(x, params):
    num_layers = len(params)
    for i, (w, b) in enumerate(params):
        x = x @ w + b
        if i < num_layers - 1:
            x = jnp.maximum(x, 0.0)
    return x


if __name__ == "__main__":
    key = jax.random.PRNGKey(0)
    batch, seq = 2, 8
    input_dim, hidden_dim, output_dim, num_layers = 32, 32, 16, 3

    kx, kp = jax.random.split(key)
    x = jax.random.normal(kx, (batch, seq, input_dim), jnp.float32)
    params = init_mlp_params(kp, input_dim, hidden_dim, output_dim, num_layers)

    out = mlp_forward(x, params)
    out = jax.block_until_ready(out)

    ref = mlp_reference(x, params)
    assert out.shape == (batch, seq, output_dim), out.shape
    # bf16 MXU inputs with f32 accumulation: compare to the f32 reference with
    # a bf16-appropriate tolerance.
    assert jnp.allclose(out, ref, atol=2e-2, rtol=2e-2), "mismatch vs reference"

    print("KERNEL_OK")
</pallas_src>

<mosaic_0001>
module attributes {stable_mosaic.version = 11 : i64} {
  func.func @kernel(%arg0: i32, %arg1: memref<16x32xf32, #tpu.memory_space<vmem>>, %arg2: memref<32x128xbf16, #tpu.memory_space<vmem>>, %arg3: memref<1x128xf32, #tpu.memory_space<vmem>>, %arg4: memref<128x128xbf16, #tpu.memory_space<vmem>>, %arg5: memref<1x128xf32, #tpu.memory_space<vmem>>, %arg6: memref<128x16xbf16, #tpu.memory_space<vmem>>, %arg7: memref<1x16xf32, #tpu.memory_space<vmem>>, %arg8: memref<16x16xf32, #tpu.memory_space<vmem>>) attributes {dimension_semantics = [#tpu.dimension_semantics<parallel>], iteration_bounds = array<i64: 1>, scalar_prefetch = 0 : i64, scratch_operands = 0 : i64, tpu.core_type = #tpu.core_type<tc>, window_params = [{transform_indices = @transform_0, window_bounds = array<i64: 16, 32>}, {pipeline_mode = #tpu.pipeline_mode<synchronous>, transform_indices = @transform_1, window_bounds = array<i64: 32, 128>}, {pipeline_mode = #tpu.pipeline_mode<synchronous>, transform_indices = @transform_2, window_bounds = array<i64: 1, 128>}, {pipeline_mode = #tpu.pipeline_mode<synchronous>, transform_indices = @transform_3, window_bounds = array<i64: 128, 128>}, {pipeline_mode = #tpu.pipeline_mode<synchronous>, transform_indices = @transform_4, window_bounds = array<i64: 1, 128>}, {pipeline_mode = #tpu.pipeline_mode<synchronous>, transform_indices = @transform_5, window_bounds = array<i64: 128, 16>}, {pipeline_mode = #tpu.pipeline_mode<synchronous>, transform_indices = @transform_6, window_bounds = array<i64: 1, 16>}, {transform_indices = @transform_7, window_bounds = array<i64: 16, 16>}]} {
    %c0 = arith.constant 0 : index
    %c0_0 = arith.constant 0 : index
    %0 = vector.load %arg1[%c0, %c0_0] : memref<16x32xf32, #tpu.memory_space<vmem>>, vector<16x32xf32>
    %1 = arith.truncf %0 : vector<16x32xf32> to vector<16x32xbf16>
    %c0_1 = arith.constant 0 : index
    %c0_2 = arith.constant 0 : index
    %2 = vector.load %arg2[%c0_1, %c0_2] : memref<32x128xbf16, #tpu.memory_space<vmem>>, vector<32x128xbf16>
    %c0_3 = arith.constant 0 : index
    %c0_4 = arith.constant 0 : index
    %3 = vector.load %arg3[%c0_3, %c0_4] : memref<1x128xf32, #tpu.memory_space<vmem>>, vector<1x128xf32>
    %cst = arith.constant dense<0.000000e+00> : vector<16x128xf32>
    %4 = tpu.matmul %1, %2, %cst {dimension_numbers = #tpu.dot_dimension_numbers<[1], [0], [0], [1], [0, 0, 1, 1], [], []>} : vector<16x32xbf16>, vector<32x128xbf16>, vector<16x128xf32> -> vector<16x128xf32>
    %5 = vector.broadcast %3 : vector<1x128xf32> to vector<16x128xf32>
    %6 = arith.addf %4, %5 : vector<16x128xf32>
    %cst_5 = arith.constant 0.000000e+00 : f32
    %7 = vector.broadcast %cst_5 : f32 to vector<16x128xf32>
    %8 = arith.maximumf %6, %7 : vector<16x128xf32>
    %9 = arith.truncf %8 : vector<16x128xf32> to vector<16x128xbf16>
    %c0_6 = arith.constant 0 : index
    %c0_7 = arith.constant 0 : index
    %10 = vector.load %arg4[%c0_6, %c0_7] : memref<128x128xbf16, #tpu.memory_space<vmem>>, vector<128x128xbf16>
    %c0_8 = arith.constant 0 : index
    %c0_9 = arith.constant 0 : index
    %11 = vector.load %arg5[%c0_8, %c0_9] : memref<1x128xf32, #tpu.memory_space<vmem>>, vector<1x128xf32>
    %cst_10 = arith.constant dense<0.000000e+00> : vector<16x128xf32>
    %12 = tpu.matmul %9, %10, %cst_10 {dimension_numbers = #tpu.dot_dimension_numbers<[1], [0], [0], [1], [0, 0, 1, 1], [], []>} : vector<16x128xbf16>, vector<128x128xbf16>, vector<16x128xf32> -> vector<16x128xf32>
    %13 = vector.broadcast %11 : vector<1x128xf32> to vector<16x128xf32>
    %14 = arith.addf %12, %13 : vector<16x128xf32>
    %cst_11 = arith.constant 0.000000e+00 : f32
    %15 = vector.broadcast %cst_11 : f32 to vector<16x128xf32>
    %16 = arith.maximumf %14, %15 : vector<16x128xf32>
    %17 = arith.truncf %16 : vector<16x128xf32> to vector<16x128xbf16>
    %c0_12 = arith.constant 0 : index
    %c0_13 = arith.constant 0 : index
    %18 = vector.load %arg6[%c0_12, %c0_13] : memref<128x16xbf16, #tpu.memory_space<vmem>>, vector<128x16xbf16>
    %c0_14 = arith.constant 0 : index
    %c0_15 = arith.constant 0 : index
    %19 = vector.load %arg7[%c0_14, %c0_15] : memref<1x16xf32, #tpu.memory_space<vmem>>, vector<1x16xf32>
    %cst_16 = arith.constant dense<0.000000e+00> : vector<16x16xf32>
    %20 = tpu.matmul %17, %18, %cst_16 {dimension_numbers = #tpu.dot_dimension_numbers<[1], [0], [0], [1], [0, 0, 1, 1], [], []>} : vector<16x128xbf16>, vector<128x16xbf16>, vector<16x16xf32> -> vector<16x16xf32>
    %21 = vector.broadcast %19 : vector<1x16xf32> to vector<16x16xf32>
    %22 = arith.addf %20, %21 : vector<16x16xf32>
    %c0_17 = arith.constant 0 : index
    %c0_18 = arith.constant 0 : index
    %23 = vector.load %arg8[%c0_17, %c0_18] : memref<16x16xf32, #tpu.memory_space<vmem>>, vector<16x16xf32>
    tpu.vector_store %arg8[%c0_17, %c0_18], %22 {strides = array<i32>} : memref<16x16xf32, #tpu.memory_space<vmem>>, vector<16x16xf32>,
    return
  }
  func.func @transform_0(%arg0: i32) -> (i32, i32) {
    %c0_i32 = arith.constant 0 : i32
    %c0_i32_0 = arith.constant 0 : i32
    return %arg0, %c0_i32 : i32, i32
  }
  func.func @transform_1(%arg0: i32) -> (i32, i32) {
    %c0_i32 = arith.constant 0 : i32
    %c0_i32_0 = arith.constant 0 : i32
    %c0_i32_1 = arith.constant 0 : i32
    return %c0_i32, %c0_i32_0 : i32, i32
  }
  func.func @transform_2(%arg0: i32) -> (i32, i32) {
    %c0_i32 = arith.constant 0 : i32
    %c0_i32_0 = arith.constant 0 : i32
    %c0_i32_1 = arith.constant 0 : i32
    return %c0_i32, %c0_i32_0 : i32, i32
  }
  func.func @transform_3(%arg0: i32) -> (i32, i32) {
    %c0_i32 = arith.constant 0 : i32
    %c0_i32_0 = arith.constant 0 : i32
    %c0_i32_1 = arith.constant 0 : i32
    return %c0_i32, %c0_i32_0 : i32, i32
  }
  func.func @transform_4(%arg0: i32) -> (i32, i32) {
    %c0_i32 = arith.constant 0 : i32
    %c0_i32_0 = arith.constant 0 : i32
    %c0_i32_1 = arith.constant 0 : i32
    return %c0_i32, %c0_i32_0 : i32, i32
  }
  func.func @transform_5(%arg0: i32) -> (i32, i32) {
    %c0_i32 = arith.constant 0 : i32
    %c0_i32_0 = arith.constant 0 : i32
    %c0_i32_1 = arith.constant 0 : i32
    return %c0_i32, %c0_i32_0 : i32, i32
  }
  func.func @transform_6(%arg0: i32) -> (i32, i32) {
    %c0_i32 = arith.constant 0 : i32
    %c0_i32_0 = arith.constant 0 : i32
    %c0_i32_1 = arith.constant 0 : i32
    return %c0_i32, %c0_i32_0 : i32, i32
  }
  func.func @transform_7(%arg0: i32) -> (i32, i32) {
    %c0_i32 = arith.constant 0 : i32
    %c0_i32_0 = arith.constant 0 : i32
    return %arg0, %c0_i32 : i32, i32
  }
}

module attributes {stable_mosaic.version = 11 : i64} {
  func.func @kernel(%arg0: i32, %arg1: memref<16x32xf32, #tpu.memory_space<vmem>>, %arg2: memref<32x128xbf16, #tpu.memory_space<vmem>>, %arg3: memref<1x128xf32, #tpu.memory_space<vmem>>, %arg4: memref<128x128xbf16, #tpu.memory_space<vmem>>, %arg5: memref<1x128xf32, #tpu.memory_space<vmem>>, %arg6: memref<128x16xbf16, #tpu.memory_space<vmem>>, %arg7: memref<1x16xf32, #tpu.memory_space<vmem>>, %arg8: memref<16x16xf32, #tpu.memory_space<vmem>>) attributes {dimension_semantics = [#tpu.dimension_semantics<parallel>], iteration_bounds = array<i64: 1>, scalar_prefetch = 0 : i64, scratch_operands = 0 : i64, tpu.core_type = #tpu.core_type<tc>, window_params = [{transform_indices = @transform_0, window_bounds = array<i64: 16, 32>}, {pipeline_mode = #tpu.pipeline_mode<synchronous>, transform_indices = @transform_1, window_bounds = array<i64: 32, 128>}, {pipeline_mode = #tpu.pipeline_mode<synchronous>, transform_indices = @transform_2, window_bounds = array<i64: 1, 128>}, {pipeline_mode = #tpu.pipeline_mode<synchronous>, transform_indices = @transform_3, window_bounds = array<i64: 128, 128>}, {pipeline_mode = #tpu.pipeline_mode<synchronous>, transform_indices = @transform_4, window_bounds = array<i64: 1, 128>}, {pipeline_mode = #tpu.pipeline_mode<synchronous>, transform_indices = @transform_5, window_bounds = array<i64: 128, 16>}, {pipeline_mode = #tpu.pipeline_mode<synchronous>, transform_indices = @transform_6, window_bounds = array<i64: 1, 16>}, {transform_indices = @transform_7, window_bounds = array<i64: 16, 16>}]} {
    %c0 = arith.constant 0 : index
    %c0_0 = arith.constant 0 : index
    %0 = vector.load %arg1[%c0, %c0_0] : memref<16x32xf32, #tpu.memory_space<vmem>>, vector<16x32xf32>
    %1 = arith.truncf %0 : vector<16x32xf32> to vector<16x32xbf16>
    %c0_1 = arith.constant 0 : index
    %c0_2 = arith.constant 0 : index
    %2 = vector.load %arg2[%c0_1, %c0_2] : memref<32x128xbf16, #tpu.memory_space<vmem>>, vector<32x128xbf16>
    %c0_3 = arith.constant 0 : index
    %c0_4 = arith.constant 0 : index
    %3 = vector.load %arg3[%c0_3, %c0_4] : memref<1x128xf32, #tpu.memory_space<vmem>>, vector<1x128xf32>
    %cst = arith.constant dense<0.000000e+00> : vector<16x128xf32>
    %4 = tpu.matmul %1, %2, %cst {dimension_numbers = #tpu.dot_dimension_numbers<[1], [0], [0], [1], [0, 0, 1, 1], [], []>} : vector<16x32xbf16>, vector<32x128xbf16>, vector<16x128xf32> -> vector<16x128xf32>
    %5 = vector.broadcast %3 : vector<1x128xf32> to vector<16x128xf32>
    %6 = arith.addf %4, %5 : vector<16x128xf32>
    %cst_5 = arith.constant 0.000000e+00 : f32
    %7 = vector.broadcast %cst_5 : f32 to vector<16x128xf32>
    %8 = arith.maximumf %6, %7 : vector<16x128xf32>
    %9 = arith.truncf %8 : vector<16x128xf32> to vector<16x128xbf16>
    %c0_6 = arith.constant 0 : index
    %c0_7 = arith.constant 0 : index
    %10 = vector.load %arg4[%c0_6, %c0_7] : memref<128x128xbf16, #tpu.memory_space<vmem>>, vector<128x128xbf16>
    %c0_8 = arith.constant 0 : index
    %c0_9 = arith.constant 0 : index
    %11 = vector.load %arg5[%c0_8, %c0_9] : memref<1x128xf32, #tpu.memory_space<vmem>>, vector<1x128xf32>
    %cst_10 = arith.constant dense<0.000000e+00> : vector<16x128xf32>
    %12 = tpu.matmul %9, %10, %cst_10 {dimension_numbers = #tpu.dot_dimension_numbers<[1], [0], [0], [1], [0, 0, 1, 1], [], []>} : vector<16x128xbf16>, vector<128x128xbf16>, vector<16x128xf32> -> vector<16x128xf32>
    %13 = vector.broadcast %11 : vector<1x128xf32> to vector<16x128xf32>
    %14 = arith.addf %12, %13 : vector<16x128xf32>
    %cst_11 = arith.constant 0.000000e+00 : f32
    %15 = vector.broadcast %cst_11 : f32 to vector<16x128xf32>
    %16 = arith.maximumf %14, %15 : vector<16x128xf32>
    %17 = arith.truncf %16 : vector<16x128xf32> to vector<16x128xbf16>
    %c0_12 = arith.constant 0 : index
    %c0_13 = arith.constant 0 : index
    %18 = vector.load %arg6[%c0_12, %c0_13] : memref<128x16xbf16, #tpu.memory_space<vmem>>, vector<128x16xbf16>
    %c0_14 = arith.constant 0 : index
    %c0_15 = arith.constant 0 : index
    %19 = vector.load %arg7[%c0_14, %c0_15] : memref<1x16xf32, #tpu.memory_space<vmem>>, vector<1x16xf32>
    %cst_16 = arith.constant dense<0.000000e+00> : vector<16x16xf32>
    %20 = tpu.matmul %17, %18, %cst_16 {dimension_numbers = #tpu.dot_dimension_numbers<[1], [0], [0], [1], [0, 0, 1, 1], [], []>} : vector<16x128xbf16>, vector<128x16xbf16>, vector<16x16xf32> -> vector<16x16xf32>
    %21 = vector.broadcast %19 : vector<1x16xf32> to vector<16x16xf32>
    %22 = arith.addf %20, %21 : vector<16x16xf32>
    %c0_17 = arith.constant 0 : index
    %c0_18 = arith.constant 0 : index
    %23 = vector.load %arg8[%c0_17, %c0_18] : memref<16x16xf32, #tpu.memory_space<vmem>>, vector<16x16xf32>
    tpu.vector_store %arg8[%c0_17, %c0_18], %22 {strides = array<i32>} : memref<16x16xf32, #tpu.memory_space<vmem>>, vector<16x16xf32>,
    return
  }
  func.func @transform_0(%arg0: i32) -> (i32, i32) {
    %c0_i32 = arith.constant 0 : i32
    %c0_i32_0 = arith.constant 0 : i32
    return %arg0, %c0_i32 : i32, i32
  }
  func.func @transform_1(%arg0: i32) -> (i32, i32) {
    %c0_i32 = arith.constant 0 : i32
    %c0_i32_0 = arith.constant 0 : i32
    %c0_i32_1 = arith.constant 0 : i32
    return %c0_i32, %c0_i32_0 : i32, i32
  }
  func.func @transform_2(%arg0: i32) -> (i32, i32) {
    %c0_i32 = arith.constant 0 : i32
    %c0_i32_0 = arith.constant 0 : i32
    %c0_i32_1 = arith.constant 0 : i32
    return %c0_i32, %c0_i32_0 : i32, i32
  }
  func.func @transform_3(%arg0: i32) -> (i32, i32) {
    %c0_i32 = arith.constant 0 : i32
    %c0_i32_0 = arith.constant 0 : i32
    %c0_i32_1 = arith.constant 0 : i32
    return %c0_i32, %c0_i32_0 : i32, i32
  }
  func.func @transform_4(%arg0: i32) -> (i32, i32) {
    %c0_i32 = arith.constant 0 : i32
    %c0_i32_0 = arith.constant 0 : i32
    %c0_i32_1 = arith.constant 0 : i32
    return %c0_i32, %c0_i32_0 : i32, i32
  }
  func.func @transform_5(%arg0: i32) -> (i32, i32) {
    %c0_i32 = arith.constant 0 : i32
    %c0_i32_0 = arith.constant 0 : i32
    %c0_i32_1 = arith.constant 0 : i32
    return %c0_i32, %c0_i32_0 : i32, i32
  }
  func.func @transform_6(%arg0: i32) -> (i32, i32) {
    %c0_i32 = arith.constant 0 : i32
    %c0_i32_0 = arith.constant 0 : i32
    %c0_i32_1 = arith.constant 0 : i32
    return %c0_i32, %c0_i32_0 : i32, i32
  }
  func.func @transform_7(%arg0: i32) -> (i32, i32) {
    %c0_i32 = arith.constant 0 : i32
    %c0_i32_0 = arith.constant 0 : i32
    return %arg0, %c0_i32 : i32, i32
  }
}

</mosaic_0001>

<bundles_post_ra>
// kernel: tpu_custom_call.1
= control target key start
LH: loop header
LB: loop body
LE: loop exit
PB: predicated region body
PF: predicated region fallthrough
CT: control target
= control target key end

     0   :  { %12 = vsyncpa [#allocation3], 0  ;;  %s707_s0 = inlined_call_operand.hbm [shape: f32[16,32], index: 0, kind: input, shape index: {}]   ;;  %s708_s1 = inlined_call_operand.hbm [shape: bf16[32,128], index: 1, kind: input, shape index: {}]   ;;  %s709_s2 = inlined_call_operand.vmem [shape: f32[1,128], index: 2, kind: input, shape index: {}]   ;;  %s710_s3 = inlined_call_operand.vmem [shape: bf16[128,128], index: 3, kind: input, shape index: {}]   ;;  %s711_s4 = inlined_call_operand.vmem [shape: f32[1,128], index: 4, kind: input, shape index: {}]   ;;  %s712_s5 = inlined_call_operand.vmem [shape: bf16[128,16], index: 5, kind: input, shape index: {}]   ;;  %s713_s6 = inlined_call_operand.vmem [shape: f32[1,16], index: 6, kind: input, shape index: {}]   ;;  %s714_s7 = inlined_call_operand.hbm [shape: f32[16,16], index: 7, kind: output, shape index: {}]  }
   0x1   :  { %13 = vsyncpa [#allocation6], 0 }
   0x2   :  { %14 = vsyncpa [#allocation4], 0  ;;  %s562_s24 = smov [#allocation2]  }
   0x3   :  { %s20_s25 = sshll.u32 %s562_s24, 4  ;;  %s21_s25 = int_to_ptr.vmem [resolvable:$true] %s20_s25 }
   0x4   :  { %s504_s26 = scalar_lea.vmem %s21_s25, 256  ;;  %p509_p1 = scmp.lt.s32.totalorder %s21_s25, %s21_s25 }
   0x5   :  { %p505_p0 = scmp.ne.s32.totalorder %s21_s25, %s504_s26  ;;  %p510_p2 = scmp.lt.s32.totalorder %s504_s26, %s504_s26 }
   0x7   :  { %p511_p3 = por %p510_p2, %p509_p1 }
   0x9   :  { %p512_p4 = pnand %p511_p3, %p505_p0 }
   0xb   :  { %515 = shalt.err (!%p512_p4)
}
   0xc   :  { %s563_s27 = smov 128   ;;  %s564_s28 = smov 8  }
   0xd   :  { %26 = dma.hbm_to_vmem [thread:$0]  %s707_s0, 256, %s21_s25, [#allocation3], %s563_s27, %s563_s27, %s564_s28  }
   0xe   :  { %s565_s8 = smov [#allocation5]  }
   0xf   :  { %s32_s9 = sshll.u32 %s565_s8, 4  ;;  %s33_s9 = int_to_ptr.vmem [resolvable:$true] %s32_s9 }
  0x10   :  { %s524_s10 = scalar_lea.vmem %s33_s9, 256  ;;  %p529_p6 = scmp.lt.s32.totalorder %s33_s9, %s33_s9 }
  0x11   :  { %p525_p5 = scmp.ne.s32.totalorder %s33_s9, %s524_s10  ;;  %p530_p7 = scmp.lt.s32.totalorder %s524_s10, %s524_s10 }
  0x13   :  { %p531_p8 = por %p530_p7, %p529_p6 }
  0x15   :  { %p532_p9 = pnand %p531_p8, %p525_p5 }
  0x17   :  { %535 = shalt.err (!%p532_p9)
}
  0x18   :  { %s566_s11 = smov 64   ;;  %s567_s12 = smov 4  }
  0x19   :  { %38 = dma.hbm_to_vmem [thread:$0]  %s708_s1, 256, %s33_s9, [#allocation6], %s566_s11, %s566_s11, %s567_s12  }
  0x1a   :  { %556 = dma.done.wait [#allocation3], 256  }
  0x1b   :  { %557 = vsyncadd [#allocation3], 4294967040 }
  0x1c   :  { %558 = dma.done.wait [#allocation6], 256  }
  0x1d   :  { %559 = vsyncadd [#allocation6], 4294967040  ;;  %v568_v0 = vmov 0.0   ;;  %vm569_vm0 = vmmov 0   ;;  %v478_v1 = vld [vmem:[#allocation5 + $0x8] sm:$0xff]   ;;  %v479_v2 = vld [vmem:[#allocation5] sm:$0xff]  }
  0x1e   :  { %421 = vmatprep.subr.bf16.mxu0 %v568_v0  ;;  %425 = vmatprep.mubr.msk.bf16.mxu0 %vm569_vm0, %v568_v0  ;;  %v56_v3 = vld [vmem:[#allocation2] sm:$0xff]  ;;  %v57_v4 = vld [vmem:[#allocation2 + $0x8] sm:$0xff]  ;;  %v480_v5 = vld [vmem:[%s710_s3 + $0x38] sm:$0xff]   ;;  %vm82_vm1 = vcmask 261120   ;;  %vm357_vm2 = vcmask 130048  }
  0x1f   :  { %429 = vmatprep.subr.bf16.mxu1 %v568_v0  ;;  %445 = vmatprep.mubr.msk.bf16.mxu1 %vm569_vm0, %v568_v0  ;;  %v58_v6 = vpack.c.bf16 %v57_v4, %v56_v3  ;;  %v481_v7 = vld [vmem:[%s710_s3 + $0x30] sm:$0xff]   ;;  %v482_v8 = vld [vmem:[%s710_s3 + $0x28] sm:$0xff]   ;;  %v483_v9 = vld [vmem:[%s710_s3 + $0x20] sm:$0xff]  }
  0x20   :  { %422 = vmatpush3.bf16.msra.mxu0 %v478_v1  ;;  %430 = vmatpush3.bf16.msra.mxu1 %v480_v5  ;;  %v484_v10 = vld [vmem:[%s710_s3 + $0x18] sm:$0xff]   ;;  %v485_v11 = vld [vmem:[%s710_s3 + $0x10] sm:$0xff]   ;;  %v486_v12 = vld [vmem:[%s710_s3 + $0x8] sm:$0xff]  }
  0x21   :  { %423 = vmatprep.subr.bf16.mxu0 %v568_v0  ;;  %431 = vmatprep.subr.bf16.mxu1 %v568_v0  ;;  %v487_v13 = vld [vmem:[%s710_s3] sm:$0xff]   ;;  %v488_v14 = vld [vmem:[%s712_s5 + $0x38] sm:$0xff]   ;;  %v489_v15 = vld [vmem:[%s712_s5 + $0x30] sm:$0xff]  }
  0x22   :  { %v490_v16 = vld [vmem:[%s712_s5 + $0x28] sm:$0xff]   ;;  %v491_v17 = vld [vmem:[%s712_s5 + $0x20] sm:$0xff]   ;;  %v492_v18 = vld [vmem:[%s712_s5 + $0x18] sm:$0xff]  }
  0x23   :  { %v378_v19 = vld [vmem:[%s709_s2] ss:$0 sm:$0xff]  ;;  %v493_v29 = vld [vmem:[%s712_s5 + $0x10] sm:$0xff]   ;;  %v494_v30 = vld [vmem:[%s712_s5 + $0x8] sm:$0xff]  }
  0x24   :  { %424 = vmatpush3.bf16.msra.mxu0 %v479_v2  ;;  %432 = vmatpush3.bf16.msra.mxu1 %v481_v7  ;;  %v495_v31 = vld [vmem:[%s712_s5] sm:$0xff]   ;;  %s570_s5 = smov [#allocation7]  }
  0x25   :  { %449 = vmatprep.subr.bf16.mxu0 %v568_v0  ;;  %433 = vmatprep.subr.bf16.mxu1 %v568_v0  ;;  %v382_v32 = vld [vmem:[%s711_s4] ss:$0 sm:$0xff]  ;;  %s365_s4 = sshll.u32 %s570_s5, 4  ;;  %s366_s4 = int_to_ptr.vmem [resolvable:$true] %s365_s4 }
  0x26   :  { %v391_v42 = vld [vmem:[%s713_s6] ss:$0 sm:$0xff]  ;;  %s536_s26 = scalar_lea.vmem %s366_s4, 256  ;;  %p541_p11 = scmp.lt.s32.totalorder %s366_s4, %s366_s4 }
  0x27   :  { %426 = vmatmul.mubr.msk.bf16.vlgmr.msra.gmra.mxu0 %vm82_vm1, %v58_v6  ;;  %p537_p10 = scmp.ne.s32.totalorder %s366_s4, %s536_s26  ;;  %p542_p12 = scmp.lt.s32.totalorder %s536_s26, %s536_s26 }
  0x28   :  { %465 = vmatprep.mubr.msk.bf16.mxu0 %vm569_vm0, %v568_v0  ;;  %434 = vmatpush3.bf16.msra.mxu1 %v482_v8 }
  0x29   :  { %435 = vmatprep.subr.bf16.mxu1 %v568_v0  ;;  %450 = vmatpush3.bf16.msra.mxu0 %v488_v14  ;;  %p543_p13 = por %p542_p12, %p541_p11 }
  0x2a   :  { %451 = vmatprep.subr.bf16.mxu0 %v568_v0 }
  0x2b   :  { %p544_p0 = pnand %p543_p13, %p537_p10 }
  0x2c   :  { %436 = vmatpush3.bf16.msra.mxu1 %v483_v9 }
  0x2d   :  { %437 = vmatprep.subr.bf16.mxu1 %v568_v0  ;;  %452 = vmatpush3.bf16.msra.mxu0 %v489_v15 }
  0x2e   :  { %453 = vmatprep.subr.bf16.mxu0 %v568_v0 }
  0x30   :  { %438 = vmatpush3.bf16.msra.mxu1 %v484_v10 }
  0x31   :  { %439 = vmatprep.subr.bf16.mxu1 %v568_v0  ;;  %454 = vmatpush3.bf16.msra.mxu0 %v490_v16 }
  0x32   :  { %455 = vmatprep.subr.bf16.mxu0 %v568_v0 }
  0x34   :  { %440 = vmatpush3.bf16.msra.mxu1 %v485_v11 }
  0x35   :  { %441 = vmatprep.subr.bf16.mxu1 %v568_v0  ;;  %456 = vmatpush3.bf16.msra.mxu0 %v491_v17 }
  0x36   :  { %457 = vmatprep.subr.bf16.mxu0 %v568_v0 }
  0x38   :  { %442 = vmatpush3.bf16.msra.mxu1 %v486_v12 }
  0x39   :  { %443 = vmatprep.subr.bf16.mxu1 %v568_v0  ;;  %458 = vmatpush3.bf16.msra.mxu0 %v492_v18 }
  0x3a   :  { %459 = vmatprep.subr.bf16.mxu0 %v568_v0 }
  0x3c   :  { %444 = vmatpush3.bf16.msra.mxu1 %v487_v13 }
  0x3d   :  { %460 = vmatpush3.bf16.msra.mxu0 %v493_v29 }
  0x3e   :  { %461 = vmatprep.subr.bf16.mxu0 %v568_v0 }
  0x41   :  { %462 = vmatpush3.bf16.msra.mxu0 %v494_v30 }
  0x42   :  { %463 = vmatprep.subr.bf16.mxu0 %v568_v0 }
  0x45   :  { %464 = vmatpush3.bf16.msra.mxu0 %v495_v31 }
  0xe7   :  { %v120_v20 = vpop.f32.mrf.mxu0 }
  0xe8   :  { %v121_v22 = vadd.f32 %v378_v19, %v120_v20 }
  0xe9   :  { %v427_v21 = vpop.f32.mrf.mxu0 }
  0xea   :  { %v127_v26 = vmax.f32 %v121_v22, 0.0 }
  0xeb   :  { %v123_v23 = vpop.f32.mrf.mxu0 }
  0xec   :  { %v124_v24 = vadd.f32 %v378_v19, %v123_v23 }
  0xed   :  { %v428_v25 = vpop.f32.mrf.mxu0 }
  0xee   :  { %v128_v27 = vmax.f32 %v124_v24, 0.0 }
  0xf0   :  { %v129_v28 = vpack.c.bf16 %v128_v27, %v127_v26 }
  0xf2   :  { %446 = vmatmul.mubr.bf16.vlgmr.msra.gmra.mxu1 %v129_v28 }
 0x1b2   :  { %v235_v33 = vpop.f32.mrf.mxu1 }
 0x1b3   :  { %v236_v35 = vadd.f32 %v382_v32, %v235_v33 }
 0x1b4   :  { %v447_v34 = vpop.f32.mrf.mxu1 }
 0x1b5   :  { %v242_v39 = vmax.f32 %v236_v35, 0.0 }
 0x1b6   :  { %v238_v36 = vpop.f32.mrf.mxu1 }
 0x1b7   :  { %v239_v37 = vadd.f32 %v382_v32, %v238_v36 }
 0x1b8   :  { %v448_v38 = vpop.f32.mrf.mxu1 }
 0x1b9   :  { %v243_v40 = vmax.f32 %v239_v37, 0.0 }
 0x1bb   :  { %v244_v41 = vpack.c.bf16 %v243_v40, %v242_v39 }
 0x1bd   :  { %466 = vmatmul.mubr.bf16.vlgmr.msra.gmra.mxu0 %v244_v41 }
 0x27d   :  { %v350_v43 = vpop.f32.mrf.mxu0 }
 0x27e   :  { %v351_v44 = vadd.f32 %v391_v42, %v350_v43 }
 0x27f   :  { %v467_v45 = vpop.f32.mrf.mxu0 }
 0x280   :  { %358 = vst.msk [vmem:[#allocation7] sm:$0xff] %vm357_vm2, %v351_v44 }
 0x281   :  { %v353_v46 = vpop.f32.mrf.mxu0 }
 0x282   :  { %v354_v47 = vadd.f32 %v391_v42, %v353_v46 }
 0x283   :  { %v468_v48 = vpop.f32.mrf.mxu0 }
 0x284   :  { %359 = vst.msk [vmem:[#allocation7 + $0x8] sm:$0xff] %vm357_vm2, %v354_v47 }
 0x285   :  { %547 = shalt.err (!%p544_p0)
}
 0x286   :  { %371 = dma.vmem_to_hbm [thread:$0]  %s366_s4, 256, %s714_s7, [#allocation4], %s563_s27, %s563_s27, %s564_s28  }
 0x287   :  { %560 = dma.done.wait [#allocation4], 256  }
 0x288   :  { %561 = vsyncadd [#allocation4], 4294967040 }
 0x289   :  { %375 = vsyncpa [#allocation3], 1 }
 0x28a   :  { %376 = vsyncpa [#allocation6], 1 }
 0x28b   :  { %377 = vsyncpa [#allocation4], 1 }

// kernel: tpu_custom_call.1
= control target key start
LH: loop header
LB: loop body
LE: loop exit
PB: predicated region body
PF: predicated region fallthrough
CT: control target
= control target key end

     0   :  { %12 = vsyncpa [#allocation3], 0  ;;  %s707_s0 = inlined_call_operand.hbm [shape: f32[16,32], index: 0, kind: input, shape index: {}]   ;;  %s708_s1 = inlined_call_operand.hbm [shape: bf16[32,128], index: 1, kind: input, shape index: {}]   ;;  %s709_s2 = inlined_call_operand.vmem [shape: f32[1,128], index: 2, kind: input, shape index: {}]   ;;  %s710_s3 = inlined_call_operand.vmem [shape: bf16[128,128], index: 3, kind: input, shape index: {}]   ;;  %s711_s4 = inlined_call_operand.vmem [shape: f32[1,128], index: 4, kind: input, shape index: {}]   ;;  %s712_s5 = inlined_call_operand.vmem [shape: bf16[128,16], index: 5, kind: input, shape index: {}]   ;;  %s713_s6 = inlined_call_operand.vmem [shape: f32[1,16], index: 6, kind: input, shape index: {}]   ;;  %s714_s7 = inlined_call_operand.hbm [shape: f32[16,16], index: 7, kind: output, shape index: {}]  }
   0x1   :  { %13 = vsyncpa [#allocation6], 0 }
   0x2   :  { %14 = vsyncpa [#allocation4], 0  ;;  %s562_s24 = smov [#allocation2]  }
   0x3   :  { %s20_s25 = sshll.u32 %s562_s24, 4  ;;  %s21_s25 = int_to_ptr.vmem [resolvable:$true] %s20_s25 }
   0x4   :  { %s504_s26 = scalar_lea.vmem %s21_s25, 256  ;;  %p509_p1 = scmp.lt.s32.totalorder %s21_s25, %s21_s25 }
   0x5   :  { %p505_p0 = scmp.ne.s32.totalorder %s21_s25, %s504_s26  ;;  %p510_p2 = scmp.lt.s32.totalorder %s504_s26, %s504_s26 }
   0x7   :  { %p511_p3 = por %p510_p2, %p509_p1 }
   0x9   :  { %p512_p4 = pnand %p511_p3, %p505_p0 }
   0xb   :  { %515 = shalt.err (!%p512_p4)
}
   0xc   :  { %s563_s27 = smov 128   ;;  %s564_s28 = smov 8  }
   0xd   :  { %26 = dma.hbm_to_vmem [thread:$0]  %s707_s0, 256, %s21_s25, [#allocation3], %s563_s27, %s563_s27, %s564_s28  }
   0xe   :  { %s565_s8 = smov [#allocation5]  }
   0xf   :  { %s32_s9 = sshll.u32 %s565_s8, 4  ;;  %s33_s9 = int_to_ptr.vmem [resolvable:$true] %s32_s9 }
  0x10   :  { %s524_s10 = scalar_lea.vmem %s33_s9, 256  ;;  %p529_p6 = scmp.lt.s32.totalorder %s33_s9, %s33_s9 }
  0x11   :  { %p525_p5 = scmp.ne.s32.totalorder %s33_s9, %s524_s10  ;;  %p530_p7 = scmp.lt.s32.totalorder %s524_s10, %s524_s10 }
  0x13   :  { %p531_p8 = por %p530_p7, %p529_p6 }
  0x15   :  { %p532_p9 = pnand %p531_p8, %p525_p5 }
  0x17   :  { %535 = shalt.err (!%p532_p9)
}
  0x18   :  { %s566_s11 = smov 64   ;;  %s567_s12 = smov 4  }
  0x19   :  { %38 = dma.hbm_to_vmem [thread:$0]  %s708_s1, 256, %s33_s9, [#allocation6], %s566_s11, %s566_s11, %s567_s12  }
  0x1a   :  { %556 = dma.done.wait [#allocation3], 256  }
  0x1b   :  { %557 = vsyncadd [#allocation3], 4294967040 }
  0x1c   :  { %558 = dma.done.wait [#allocation6], 256  }
  0x1d   :  { %559 = vsyncadd [#allocation6], 4294967040  ;;  %v568_v0 = vmov 0.0   ;;  %vm569_vm0 = vmmov 0   ;;  %v478_v1 = vld [vmem:[#allocation5 + $0x8] sm:$0xff]   ;;  %v479_v2 = vld [vmem:[#allocation5] sm:$0xff]  }
  0x1e   :  { %421 = vmatprep.subr.bf16.mxu0 %v568_v0  ;;  %425 = vmatprep.mubr.msk.bf16.mxu0 %vm569_vm0, %v568_v0  ;;  %v56_v3 = vld [vmem:[#allocation2] sm:$0xff]  ;;  %v57_v4 = vld [vmem:[#allocation2 + $0x8] sm:$0xff]  ;;  %v480_v5 = vld [vmem:[%s710_s3 + $0x38] sm:$0xff]   ;;  %vm82_vm1 = vcmask 261120   ;;  %vm357_vm2 = vcmask 130048  }
  0x1f   :  { %429 = vmatprep.subr.bf16.mxu1 %v568_v0  ;;  %445 = vmatprep.mubr.msk.bf16.mxu1 %vm569_vm0, %v568_v0  ;;  %v58_v6 = vpack.c.bf16 %v57_v4, %v56_v3  ;;  %v481_v7 = vld [vmem:[%s710_s3 + $0x30] sm:$0xff]   ;;  %v482_v8 = vld [vmem:[%s710_s3 + $0x28] sm:$0xff]   ;;  %v483_v9 = vld [vmem:[%s710_s3 + $0x20] sm:$0xff]  }
  0x20   :  { %422 = vmatpush3.bf16.msra.mxu0 %v478_v1  ;;  %430 = vmatpush3.bf16.msra.mxu1 %v480_v5  ;;  %v484_v10 = vld [vmem:[%s710_s3 + $0x18] sm:$0xff]   ;;  %v485_v11 = vld [vmem:[%s710_s3 + $0x10] sm:$0xff]   ;;  %v486_v12 = vld [vmem:[%s710_s3 + $0x8] sm:$0xff]  }
  0x21   :  { %423 = vmatprep.subr.bf16.mxu0 %v568_v0  ;;  %431 = vmatprep.subr.bf16.mxu1 %v568_v0  ;;  %v487_v13 = vld [vmem:[%s710_s3] sm:$0xff]   ;;  %v488_v14 = vld [vmem:[%s712_s5 + $0x38] sm:$0xff]   ;;  %v489_v15 = vld [vmem:[%s712_s5 + $0x30] sm:$0xff]  }
  0x22   :  { %v490_v16 = vld [vmem:[%s712_s5 + $0x28] sm:$0xff]   ;;  %v491_v17 = vld [vmem:[%s712_s5 + $0x20] sm:$0xff]   ;;  %v492_v18 = vld [vmem:[%s712_s5 + $0x18] sm:$0xff]  }
  0x23   :  { %v378_v19 = vld [vmem:[%s709_s2] ss:$0 sm:$0xff]  ;;  %v493_v29 = vld [vmem:[%s712_s5 + $0x10] sm:$0xff]   ;;  %v494_v30 = vld [vmem:[%s712_s5 + $0x8] sm:$0xff]  }
  0x24   :  { %424 = vmatpush3.bf16.msra.mxu0 %v479_v2  ;;  %432 = vmatpush3.bf16.msra.mxu1 %v481_v7  ;;  %v495_v31 = vld [vmem:[%s712_s5] sm:$0xff]   ;;  %s570_s5 = smov [#allocation7]  }
  0x25   :  { %449 = vmatprep.subr.bf16.mxu0 %v568_v0  ;;  %433 = vmatprep.subr.bf16.mxu1 %v568_v0  ;;  %v382_v32 = vld [vmem:[%s711_s4] ss:$0 sm:$0xff]  ;;  %s365_s4 = sshll.u32 %s570_s5, 4  ;;  %s366_s4 = int_to_ptr.vmem [resolvable:$true] %s365_s4 }
  0x26   :  { %v391_v42 = vld [vmem:[%s713_s6] ss:$0 sm:$0xff]  ;;  %s536_s26 = scalar_lea.vmem %s366_s4, 256  ;;  %p541_p11 = scmp.lt.s32.totalorder %s366_s4, %s366_s4 }
  0x27   :  { %426 = vmatmul.mubr.msk.bf16.vlgmr.msra.gmra.mxu0 %vm82_vm1, %v58_v6  ;;  %p537_p10 = scmp.ne.s32.totalorder %s366_s4, %s536_s26  ;;  %p542_p12 = scmp.lt.s32.totalorder %s536_s26, %s536_s26 }
  0x28   :  { %465 = vmatprep.mubr.msk.bf16.mxu0 %vm569_vm0, %v568_v0  ;;  %434 = vmatpush3.bf16.msra.mxu1 %v482_v8 }
  0x29   :  { %435 = vmatprep.subr.bf16.mxu1 %v568_v0  ;;  %450 = vmatpush3.bf16.msra.mxu0 %v488_v14  ;;  %p543_p13 = por %p542_p12, %p541_p11 }
  0x2a   :  { %451 = vmatprep.subr.bf16.mxu0 %v568_v0 }
  0x2b   :  { %p544_p0 = pnand %p543_p13, %p537_p10 }
  0x2c   :  { %436 = vmatpush3.bf16.msra.mxu1 %v483_v9 }
  0x2d   :  { %437 = vmatprep.subr.bf16.mxu1 %v568_v0  ;;  %452 = vmatpush3.bf16.msra.mxu0 %v489_v15 }
  0x2e   :  { %453 = vmatprep.subr.bf16.mxu0 %v568_v0 }
  0x30   :  { %438 = vmatpush3.bf16.msra.mxu1 %v484_v10 }
  0x31   :  { %439 = vmatprep.subr.bf16.mxu1 %v568_v0  ;;  %454 = vmatpush3.bf16.msra.mxu0 %v490_v16 }
  0x32   :  { %455 = vmatprep.subr.bf16.mxu0 %v568_v0 }
  0x34   :  { %440 = vmatpush3.bf16.msra.mxu1 %v485_v11 }
  0x35   :  { %441 = vmatprep.subr.bf16.mxu1 %v568_v0  ;;  %456 = vmatpush3.bf16.msra.mxu0 %v491_v17 }
  0x36   :  { %457 = vmatprep.subr.bf16.mxu0 %v568_v0 }
  0x38   :  { %442 = vmatpush3.bf16.msra.mxu1 %v486_v12 }
  0x39   :  { %443 = vmatprep.subr.bf16.mxu1 %v568_v0  ;;  %458 = vmatpush3.bf16.msra.mxu0 %v492_v18 }
  0x3a   :  { %459 = vmatprep.subr.bf16.mxu0 %v568_v0 }
  0x3c   :  { %444 = vmatpush3.bf16.msra.mxu1 %v487_v13 }
  0x3d   :  { %460 = vmatpush3.bf16.msra.mxu0 %v493_v29 }
  0x3e   :  { %461 = vmatprep.subr.bf16.mxu0 %v568_v0 }
  0x41   :  { %462 = vmatpush3.bf16.msra.mxu0 %v494_v30 }
  0x42   :  { %463 = vmatprep.subr.bf16.mxu0 %v568_v0 }
  0x45   :  { %464 = vmatpush3.bf16.msra.mxu0 %v495_v31 }
  0xe7   :  { %v120_v20 = vpop.f32.mrf.mxu0 }
  0xe8   :  { %v121_v22 = vadd.f32 %v378_v19, %v120_v20 }
  0xe9   :  { %v427_v21 = vpop.f32.mrf.mxu0 }
  0xea   :  { %v127_v26 = vmax.f32 %v121_v22, 0.0 }
  0xeb   :  { %v123_v23 = vpop.f32.mrf.mxu0 }
  0xec   :  { %v124_v24 = vadd.f32 %v378_v19, %v123_v23 }
  0xed   :  { %v428_v25 = vpop.f32.mrf.mxu0 }
  0xee   :  { %v128_v27 = vmax.f32 %v124_v24, 0.0 }
  0xf0   :  { %v129_v28 = vpack.c.bf16 %v128_v27, %v127_v26 }
  0xf2   :  { %446 = vmatmul.mubr.bf16.vlgmr.msra.gmra.mxu1 %v129_v28 }
 0x1b2   :  { %v235_v33 = vpop.f32.mrf.mxu1 }
 0x1b3   :  { %v236_v35 = vadd.f32 %v382_v32, %v235_v33 }
 0x1b4   :  { %v447_v34 = vpop.f32.mrf.mxu1 }
 0x1b5   :  { %v242_v39 = vmax.f32 %v236_v35, 0.0 }
 0x1b6   :  { %v238_v36 = vpop.f32.mrf.mxu1 }
 0x1b7   :  { %v239_v37 = vadd.f32 %v382_v32, %v238_v36 }
 0x1b8   :  { %v448_v38 = vpop.f32.mrf.mxu1 }
 0x1b9   :  { %v243_v40 = vmax.f32 %v239_v37, 0.0 }
 0x1bb   :  { %v244_v41 = vpack.c.bf16 %v243_v40, %v242_v39 }
 0x1bd   :  { %466 = vmatmul.mubr.bf16.vlgmr.msra.gmra.mxu0 %v244_v41 }
 0x27d   :  { %v350_v43 = vpop.f32.mrf.mxu0 }
 0x27e   :  { %v351_v44 = vadd.f32 %v391_v42, %v350_v43 }
 0x27f   :  { %v467_v45 = vpop.f32.mrf.mxu0 }
 0x280   :  { %358 = vst.msk [vmem:[#allocation7] sm:$0xff] %vm357_vm2, %v351_v44 }
 0x281   :  { %v353_v46 = vpop.f32.mrf.mxu0 }
 0x282   :  { %v354_v47 = vadd.f32 %v391_v42, %v353_v46 }
 0x283   :  { %v468_v48 = vpop.f32.mrf.mxu0 }
 0x284   :  { %359 = vst.msk [vmem:[#allocation7 + $0x8] sm:$0xff] %vm357_vm2, %v354_v47 }
 0x285   :  { %547 = shalt.err (!%p544_p0)
}
 0x286   :  { %371 = dma.vmem_to_hbm [thread:$0]  %s366_s4, 256, %s714_s7, [#allocation4], %s563_s27, %s563_s27, %s564_s28  }
 0x287   :  { %560 = dma.done.wait [#allocation4], 256  }
 0x288   :  { %561 = vsyncadd [#allocation4], 4294967040 }
 0x289   :  { %375 = vsyncpa [#allocation3], 1 }
 0x28a   :  { %376 = vsyncpa [#allocation6], 1 }
 0x28b   :  { %377 = vsyncpa [#allocation4], 1 }

</bundles_post_ra>
